<compile_context>
chip_gen: v6e
topology: v6e:2x2x1
jax: 0.10.0
libtpu: 0.0.40
codegen_flags: <defaults>
</compile_context>

<pallas_src>
import jax
import jax.numpy as jnp
from jax.experimental import pallas as pl
from jax.experimental.pallas import tpu as pltpu

_LANE = 128   # lane width (last-dim alignment)
_SUB = 8      # sublane alignment for 32-bit dtypes (second-to-last dim)


def _round_up(x: int, m: int) -> int:
    return ((x + m - 1) // m) * m


def _cdiv(a: int, b: int) -> int:
    return (a + b - 1) // b


def _vmem_capacity_bytes() -> int:
    """Per-core VMEM capacity; conservative (v7x) fallback if unavailable."""
    try:
        info = pltpu.get_tpu_info()
        cap = getattr(info, "vmem_capacity_bytes", None)
        if cap:
            return int(cap)
    except Exception:
        pass
    return 64 << 20


def _gcn_kernel(adj_ref, xw_ref, o_ref):
    # adj_ref: (tm, N)      row tile of the adjacency matrix, original dtype
    # xw_ref : (N, Fout_p)  pre-folded node_features @ W, f32, VMEM-resident
    # o_ref  : (tm, Fout_p)
    adj = adj_ref[...].astype(jnp.float32)   # in-kernel cast (VPU), hidden under MXU
    o_ref[...] = jnp.dot(adj, xw_ref[...], preferred_element_type=jnp.float32)


def gcn_forward(adj_matrix: jax.Array,
                node_features: jax.Array,
                weight: jax.Array,
                *,
                tm: int | None = None) -> jax.Array:
    """Pallas TPU implementation of gcn.forward: (adj @ x) @ W in float32."""
    n, n2 = adj_matrix.shape
    assert n == n2, "adjacency matrix must be square"
    assert node_features.shape[0] == n
    fin = node_features.shape[1]
    assert weight.shape[0] == fin
    fout = weight.shape[1]

    # --- Weight pre-fold: (adj @ x) @ W == adj @ (x @ W). -------------------
    x = node_features.astype(jnp.float32)
    w = weight.astype(jnp.float32)
    xw = jnp.dot(x, w, precision=jax.lax.Precision.HIGHEST)        # (n, fout)

    # Lane-pad the (tiny) folded operand so every output store is 128-lane
    # dense; the zero columns are mathematically inert and sliced off below.
    fout_p = _round_up(fout, _LANE)
    if fout_p != fout:
        xw = jnp.pad(xw, ((0, 0), (0, fout_p - fout)))

    # adj stays in its original dtype (cast happens in-kernel). Mosaic prefers
    # not to DMA bool blocks, so promote just that case to int8.
    adj = adj_matrix
    if adj.dtype == jnp.bool_:
        adj = adj.astype(jnp.int8)

    # --- Tile / VMEM sizing per chip generation. ----------------------------
    vmem_cap = _vmem_capacity_bytes()
    np_lane = _round_up(n, _LANE)                     # lanes a padded adj row occupies
    adj_row_bytes = np_lane * adj.dtype.itemsize
    # double-buffered adj tile + f32 cast of the tile + double-buffered out tile
    per_row_bytes = 2 * adj_row_bytes + 4 * np_lane + 2 * 4 * fout_p
    resident_bytes = 2 * 4 * _round_up(n, _SUB) * fout_p   # xw (pessimistic: 2 bufs)

    if tm is None:
        budget = int(0.5 * vmem_cap)
        tm = max(_SUB, (budget - resident_bytes) // max(per_row_bytes, 1))
        tm = min(tm, 1024)
        # Keep >= 2 row tiles so the "parallel" axis has work for both
        # TensorCores (v7x megacore).
        if n >= 2 * _SUB:
            tm = min(tm, _round_up(_cdiv(n, 2), _SUB))
    # (8, 128) rule: sublane dim of every block must be a multiple of 8.
    tm = _round_up(max(_SUB, min(int(tm), n)), _SUB)

    grid = (_cdiv(n, tm),)

    working_set = tm * per_row_bytes + resident_bytes
    vmem_limit = int(min(max(working_set + (8 << 20), 32 << 20),
                         int(0.85 * vmem_cap)))

    cost = pl.CostEstimate(
        flops=2 * n * n * fout_p,
        transcendentals=0,
        bytes_accessed=(n * n * adj.dtype.itemsize      # adj read
                        + n * fout_p * 4                # xw read
                        + n * fout_p * 4),              # out write
    )

    out = pl.pallas_call(
        _gcn_kernel,
        out_shape=jax.ShapeDtypeStruct((n, fout_p), jnp.float32),
        grid_spec=pltpu.PrefetchScalarGridSpec(
            num_scalar_prefetch=0,
            grid=grid,
            in_specs=[
                # adj: row tile marches with the grid; full (unpadded) K dim.
                pl.BlockSpec((tm, n), lambda i: (i, 0)),
                # xw: constant index_map -> stays VMEM-resident, DMA'd once.
                pl.BlockSpec((n, fout_p), lambda i: (0, 0)),
            ],
            out_specs=pl.BlockSpec((tm, fout_p), lambda i: (i, 0)),
        ),
        compiler_params=pltpu.CompilerParams(
            dimension_semantics=("parallel",),   # independent row tiles
            vmem_limit_bytes=vmem_limit,
        ),
        cost_estimate=cost,
    )(adj, xw)

    # Rows are already exactly n; strip only the lane padding.
    return out[:, :fout] if fout_p != fout else out


def gcn_reference(adj_matrix, node_features, weight):
    adj = adj_matrix.astype(jnp.float32)
    x = node_features.astype(jnp.float32)
    w = weight.astype(jnp.float32)
    h = jnp.dot(adj, x, precision=jax.lax.Precision.HIGHEST)
    return jnp.dot(h, w, precision=jax.lax.Precision.HIGHEST)


if __name__ == "__main__":
    # Small GCN-ish shapes: N nodes, in_features, out_features (deliberately
    # not lane-aligned to exercise partial row blocks and lane padding).
    n_nodes = 200
    in_features = 96
    out_features = 64

    key = jax.random.PRNGKey(0)
    k_adj, k_x, k_w = jax.random.split(key, 3)

    # Sparse-ish 0/1 adjacency stored as int32 (exercises the in-kernel cast).
    adj_matrix = (jax.random.uniform(k_adj, (n_nodes, n_nodes)) < 0.1).astype(jnp.int32)
    node_features = jax.random.normal(k_x, (n_nodes, in_features), dtype=jnp.float32)
    weight = jax.random.normal(k_w, (in_features, out_features), dtype=jnp.float32)

    ref = gcn_reference(adj_matrix, node_features, weight)

    # Auto-sized row tile (derived from the chip's VMEM capacity).
    out = jax.block_until_ready(gcn_forward(adj_matrix, node_features, weight))
    assert out.shape == (n_nodes, out_features)
    assert jnp.allclose(out, ref, atol=1e-2, rtol=1e-3), "mismatch vs JAX reference"

    # Explicit, non-multiple-of-8 tile request (exercises the tm round-up path
    # and a partial last row block).
    out2 = jax.block_until_ready(
        gcn_forward(adj_matrix, node_features, weight, tm=60))
    assert jnp.allclose(out2, ref, atol=1e-2, rtol=1e-3), "mismatch (tm=60)"

    print("KERNEL_OK")
</pallas_src>

<mosaic_0001>
module attributes {stable_mosaic.version = 11 : i64} {
  func.func @_gcn_kernel(%arg0: i32, %arg1: memref<104x200xi32, #tpu.memory_space<vmem>>, %arg2: memref<200x128xf32, #tpu.memory_space<vmem>>, %arg3: memref<104x128xf32, #tpu.memory_space<vmem>>) attributes {dimension_semantics = [#tpu.dimension_semantics<parallel>], iteration_bounds = array<i64: 2>, scalar_prefetch = 0 : i64, scratch_operands = 0 : i64, tpu.core_type = #tpu.core_type<tc>, window_params = [{transform_indices = @transform_0, window_bounds = array<i64: 104, 200>}, {pipeline_mode = #tpu.pipeline_mode<synchronous>, transform_indices = @transform_1, window_bounds = array<i64: 200, 128>}, {transform_indices = @transform_2, window_bounds = array<i64: 104, 128>}]} {
    %c0 = arith.constant 0 : index
    %c0_0 = arith.constant 0 : index
    %0 = vector.load %arg1[%c0, %c0_0] : memref<104x200xi32, #tpu.memory_space<vmem>>, vector<104x200xi32>
    %1 = arith.sitofp %0 : vector<104x200xi32> to vector<104x200xf32>
    %c0_1 = arith.constant 0 : index
    %c0_2 = arith.constant 0 : index
    %2 = vector.load %arg2[%c0_1, %c0_2] : memref<200x128xf32, #tpu.memory_space<vmem>>, vector<200x128xf32>
    %cst = arith.constant dense<0.000000e+00> : vector<104x128xf32>
    %3 = tpu.matmul %1, %2, %cst {dimension_numbers = #tpu.dot_dimension_numbers<[1], [0], [0], [1], [0, 0, 1, 1], [], []>} : vector<104x200xf32>, vector<200x128xf32>, vector<104x128xf32> -> vector<104x128xf32>
    %c0_3 = arith.constant 0 : index
    %c0_4 = arith.constant 0 : index
    %4 = vector.load %arg3[%c0_3, %c0_4] : memref<104x128xf32, #tpu.memory_space<vmem>>, vector<104x128xf32>
    tpu.vector_store %arg3[%c0_3, %c0_4], %3 {strides = array<i32>} : memref<104x128xf32, #tpu.memory_space<vmem>>, vector<104x128xf32>,
    return
  }
  func.func @transform_0(%arg0: i32) -> (i32, i32) {
    %c0_i32 = arith.constant 0 : i32
    %c0_i32_0 = arith.constant 0 : i32
    return %arg0, %c0_i32 : i32, i32
  }
  func.func @transform_1(%arg0: i32) -> (i32, i32) {
    %c0_i32 = arith.constant 0 : i32
    %c0_i32_0 = arith.constant 0 : i32
    %c0_i32_1 = arith.constant 0 : i32
    return %c0_i32, %c0_i32_0 : i32, i32
  }
  func.func @transform_2(%arg0: i32) -> (i32, i32) {
    %c0_i32 = arith.constant 0 : i32
    %c0_i32_0 = arith.constant 0 : i32
    return %arg0, %c0_i32 : i32, i32
  }
}

</mosaic_0001>

<bundles_post_ra>
// kernel: tpu_custom_call.1
= control target key start
LH: loop header
LB: loop body
LE: loop exit
PB: predicated region body
PF: predicated region fallthrough
CT: control target
= control target key end

     0   :  { %7 = vsyncpa [#allocation3], 0  ;;  %s1155_s0 = inlined_call_operand.hbm [shape: s32[200,200], index: 0, kind: input, shape index: {}]   ;;  %s1156_s1 = inlined_call_operand.hbm [shape: f32[200,128], index: 1, kind: input, shape index: {}]   ;;  %s1157_s2 = inlined_call_operand.hbm [shape: f32[200,128], index: 2, kind: output, shape index: {}]  }
   0x1   :  { %9 = vsyncpa [#allocation3 + $0x1], 0 }
   0x2   :  { %10 = vsyncpa [#allocation6], 0 }
   0x3   :  { %11 = vsyncpa [#allocation4], 0 }
   0x4   :  { %13 = vsyncpa [#allocation4 + $0x1], 0  ;;  %s854_s9 = smov 0   ;;  %s856_s10 = smov 0  }
   0x5   :  { %s858_s11 = smov 0   ;;  %s860_s12 = smov 0  }
   0x6 LB: > { %s875_s13 = sadd.s32 4294967295, %s827_s12   ;;  %s559_s14 = sadd.s32 4294967294, %s827_s12   ;;  %s827_s12 = sphi %s860_s12, %s1172_s12   ;;  %s823_s11 = sphi %s858_s11, %s1171_s11   ;;  %s819_s10 = sphi %s856_s10, %s1170_s10   ;;  %s815_s9 = sphi %s854_s9, %s1169_s9  }
   0x7   : > { %s879_s15 = sadd.s32 1, %s827_s12   ;;  %s26_s16 = sadd.s32 1, %s823_s11 }
   0x8   : > { %s23_s17 = ssub.s32 %s827_s12, %s879_s15  ;;  %p33_p0 = scmp.ne.s32.totalorder %s823_s11, %s819_s10 }
   0x9   : > { %p24_p1 = scmp.eq.s32.totalorder %s23_s17, 0  ;;  %p34_p2 = scmp.eq.s32.totalorder %s827_s12, 0 }
   0xa   : > { %p39_p3 = scmp.ne.s32.totalorder %s819_s10, %s815_s9  ;;  %p40_p4 = scmp.eq.s32.totalorder %s875_s13, 0 }
   0xb   : > { %s891_s18 = scalar_select %p24_p1, %s823_s11, %s26_s16  }
   0xc   : > { %p893_p5 = por %p34_p2, %p33_p0  ;;  %p899_p6 = por %p40_p4, %p39_p3 }
   0xd   : > { %p84_p7 = scmp.eq.s32.totalorder %s875_s13, 1  ;;  %p90_p8 = scmp.eq.s32.totalorder %s559_s14, 1 }
   0xe   : > { %s1161_s20 = scalar_select %p899_p6, 1, 0 }
   0xf   : > { %p560_p9 = scmp.ge.s32.totalorder %s827_s12, 1  ;;  %p97_p10 = scmp.lt.s32.totalorder %s827_s12, 3 }
  0x10   : > { %p906_p11 = por %p84_p7, %p33_p0  ;;  %p910_p12 = por %p90_p8, %p39_p3 }
  0x11   : > { %p914_p13 = pnand %p560_p9, %p97_p10  ;;  %s829_s24 = smov [#allocation5]  }
  0x12   : > { %s1162_s21 = scalar_select %p906_p11, 1, 0 }
  0x13   : > { %s1163_s22 = scalar_select %p910_p12, 1, 0 }
  0x14   : > { %p656_p1 = pneg %p914_p13  ;;  %s109_s25 = sshll.u32 %s829_s24, 4  ;;  %s110_s25 = int_to_ptr.vmem [resolvable:$true] %s109_s25 }
  0x15   : > { %s718_s26 = scalar_lea.vmem %s110_s25, 3200  ;;  %p726_p8 = scmp.lt.s32.totalorder %s110_s25, %s110_s25 }
  0x16   : > { %p657_p2 = pnand %p656_p1, %p40_p4  ;;  %p719_p7 = scmp.ne.s32.totalorder %s110_s25, %s718_s26 }
  0x17   : > { %p727_p6 = scmp.lt.s32.totalorder %s718_s26, %s718_s26 }
  0x18   : > { %p709_p0 = pneg %p657_p2 }
  0x19   : > { %p728_p12 = por %p727_p6, %p726_p8 }
  0x1a   : > { %p721_p11 = pnand %p719_p7, %p709_p0 }
  0x1c   : > { %p722_p3 = pneg %p721_p11 }
  0x1e   : > { %p729_p9 = pnand %p728_p12, %p722_p3 }
  0x20   : > { %732 = shalt.err (!%p729_p9)
}
  0x21   : > { %s830_s27 = smov 128   ;;  %s831_s28 = smov 8  }
  0x22   : > { %659 = dma.hbm_to_vmem [thread:$0]  (!%p657_p2), %s1156_s1, 3200, %s110_s25, [#allocation6], %s830_s27, %s830_s27, %s831_s28  }
  0x23   : > { %p1159_p10 = scmp.ge.s32.totalorder %s827_s12, 2 }
  0x25   : > { %119 = sbr.rel (%p1159_p10) target bundleno = 76 (0x4c), region = 20 }
  0x2a   : > { %122 = sbr.rel (!%p893_p5) target bundleno = 76 (0x4c), region = 24  ;;  %s123_s3 = sand.u32 (%p893_p5), 1, %s823_s11  }
  0x2b   : > { %s128_s4 = smul.u32 (%p893_p5), 13, %s827_s12  ;;  %s935_s14 = scalar_lea.sflag (%p893_p5), [#allocation3], %s123_s3 }
  0x2c   : > { %s647_s5 = smul.u32 (%p893_p5), 208, %s123_s3 }
  0x2d   : > { %s129_s6 = ssub.s32 (%p893_p5), 25, %s128_s4 }
  0x2e   : > { %p130_p6 = scmp.lt.s32.totalorder (%p893_p5), %s129_s6, 13  ;;  %s127_s16 = scalar_lea.vmem (%p893_p5), [#allocation2], %s647_s5 }
  0x30   : > { %s1174_s6 = smov (!%p130_p6, %s129_s6), 13 }
  0x31   : > { %s932_s7 = sshll.u32 %s1174_s6, 8 }
  0x32   : > { %s135_s8 = ssub.s32 3328, %s932_s7 }
  0x33   : > { %136 = vsyncadd %s935_s14, %s135_s8  ;;  %p565_p5 = scmp.ne.s32.totalorder %s932_s7, 0  ;;  %s596_s17 = smul.u32 3328, %s827_s12 }
  0x34   : > { %s142_s19 = sshll.u32 %s127_s16, 4  ;;  %s737_s30 = scalar_lea.hbm %s1155_s0, 6400  ;;  %s945_s19 = int_to_ptr.vmem [resolvable:$true] %s142_s19 }
  0x35   : > { %s943_s26 = scalar_lea.hbm %s1155_s0, %s596_s17 }
  0x36   : > { %s733_s27 = scalar_lea.hbm %s943_s26, %s932_s7  ;;  %p738_p2 = scmp.lt.s32.totalorder %s943_s26, %s1155_s0 }
  0x37   : > { %p734_p11 = scmp.ne.s32.totalorder %s943_s26, %s733_s27  ;;  %p739_p0 = scmp.lt.s32.totalorder %s737_s30, %s733_s27 }
  0x39   : > { %p735_p12 = pnand %p734_p11, %p565_p5  ;;  %p740_p7 = por %p739_p0, %p738_p2 }
  0x3b   : > { %p736_p1 = pneg %p735_p12 }
  0x3d   : > { %p741_p3 = pnand %p740_p7, %p736_p1 }
  0x3f   : > { %744 = shalt.err (!%p741_p3)
}
  0x40   : > { %s745_s5 = scalar_lea.vmem %s945_s19, %s932_s7  ;;  %s832_s6 = smov [#allocation2]  }
  0x41   : > { %p746_p8 = scmp.ne.s32.totalorder %s945_s19, %s745_s5  ;;  %s749_s8 = sshll.u32 %s832_s6, 4  ;;  %s750_s8 = int_to_ptr.vmem [resolvable:$false] %s749_s8 }
  0x42   : > { %s751_s16 = scalar_lea.vmem %s750_s8, 6656  ;;  %p752_p11 = scmp.lt.s32.totalorder %s945_s19, %s750_s8 }
  0x43   : > { %p747_p9 = pnand %p746_p8, %p565_p5  ;;  %p753_p12 = scmp.lt.s32.totalorder %s751_s16, %s745_s5 }
  0x45   : > { %p748_p6 = pneg %p747_p9  ;;  %p754_p10 = por %p753_p12, %p752_p11 }
  0x47   : > { %p755_p2 = pnand %p754_p10, %p748_p6 }
  0x49   : > { %758 = shalt.err (!%p755_p2)
}
  0x4a   : > { %s833_s17 = smov 256   ;;  %s834_s24 = smov 16  }
  0x4b   : > { %148 = dma.hbm_to_vmem [thread:$0]  (%p565_p5), %s943_s26, %s932_s7, %s945_s19, %s935_s14, %s833_s17, %s833_s17, %s834_s24  }
  0x4c PF: > { %154 = sbr.rel (%p914_p13) target bundleno = 381 (0x17d), region = 28  ;;  %s974_s25 = sand.u32 (!%p914_p13), 1, %s819_s10  }
  0x4d   : > { %s648_s27 = smul.u32 (!%p914_p13), 208, %s974_s25  ;;  %s157_s28 = scalar_lea.sflag (!%p914_p13), [#allocation3], %s974_s25 }
  0x4e   : > { %p1165_p10 = scmp.ne.s32.totalorder (!%p914_p13), %s1161_s20, 0 }
  0x4f   : > { %s978_s29 = scalar_lea.vmem (!%p914_p13), [#allocation2], %s648_s27 }
  0x51   : > { %802 = dma.done.wait (%p1165_p10), %s157_s28, 3328  }
  0x52   : > { %804 = vsyncadd (%p1165_p10), %s157_s28, 4294963968 }
  0x53   : > { %806 = dma.done.wait (%p40_p4), [#allocation6], 3200  }
  0x54   : > { %808 = vsyncadd (%p40_p4), [#allocation6], 4294964096  ;;  %v835_v0 = vmov 0.0   ;;  %v263_v1 = vld [vmem:[#allocation5 + $0x78] sm:$0xff]  ;;  %v262_v2 = vld [vmem:[#allocation5 + $0x70] sm:$0xff]  ;;  %vm273_vm0 = vcmask 588800  }
  0x55   : > { %313 = vmatprep.subr.mxu0 %v835_v0  ;;  %597 = vmatprep.subr.mxu1 %v835_v0  ;;  %v261_v3 = vld [vmem:[#allocation5 + $0x68] sm:$0xff]  ;;  %v260_v4 = vld [vmem:[#allocation5 + $0x60] sm:$0xff]  ;;  %v259_v5 = vld [vmem:[#allocation5 + $0x58] sm:$0xff]  ;;  %s649_s20 = smul.u32 104, %s974_s25  ;;  %s457_s7 = scalar_lea.sflag [#allocation4], %s974_s25 }
  0x56   : > { %314 = vmatpush1.msra.mxu0 %v263_v1  ;;  %622 = vmatpush1.msra.mxu1 %v263_v1  ;;  %v258_v6 = vld [vmem:[#allocation5 + $0x50] sm:$0xff]  ;;  %v257_v7 = vld [vmem:[#allocation5 + $0x48] sm:$0xff]  ;;  %v256_v8 = vld [vmem:[#allocation5 + $0x40] sm:$0xff]  ;;  %p1166_p4 = scmp.ne.s32.totalorder %s1162_s21, 0 }
  0x57   : > { %315 = vmatprep.subr.mxu0 %v835_v0  ;;  %598 = vmatprep.subr.mxu1 %v835_v0  ;;  %v255_v9 = vld [vmem:[#allocation5 + $0x38] sm:$0xff]  ;;  %v254_v10 = vld [vmem:[#allocation5 + $0x30] sm:$0xff]  ;;  %v253_v11 = vld [vmem:[#allocation5 + $0x28] sm:$0xff]  ;;  %s1078_s23 = scalar_lea.vmem [#allocation7], %s649_s20  ;;  %s464_s14 = smul.u32 (%p1166_p4), 13, %s875_s13 }
  0x58   : > { %316 = vmatpush1.msra.mxu0 %v262_v2  ;;  %623 = vmatpush1.msra.mxu1 %v262_v2  ;;  %v252_v12 = vld [vmem:[#allocation5 + $0x20] sm:$0xff]  ;;  %v251_v13 = vld [vmem:[#allocation5 + $0x18] sm:$0xff]  ;;  %v250_v14 = vld [vmem:[#allocation5 + $0x10] sm:$0xff] }
  0x59   : > { %317 = vmatprep.subr.mxu0 %v835_v0  ;;  %599 = vmatprep.subr.mxu1 %v835_v0  ;;  %v249_v15 = vld [vmem:[#allocation5 + $0x8] sm:$0xff]  ;;  %v248_v16 = vld [vmem:[#allocation5] sm:$0xff]  ;;  %v271_v18 = vld [vmem:[#allocation5 + $0xb8] sm:$0xff]  ;;  %s465_s19 = ssub.s32 (%p1166_p4), 25, %s464_s14 }
  0x5a   : > { %318 = vmatpush1.msra.mxu0 %v261_v3  ;;  %624 = vmatpush1.msra.mxu1 %v261_v3  ;;  %v272_v17 = vld [vmem:[#allocation5 + $0xc0] sm:$0xff]  ;;  %v270_v19 = vld [vmem:[#allocation5 + $0xb0] sm:$0xff]  ;;  %v269_v20 = vld [vmem:[#allocation5 + $0xa8] sm:$0xff]  ;;  %p466_p13 = scmp.lt.s32.totalorder (%p1166_p4), %s465_s19, 13 }
  0x5b   : > { %319 = vmatprep.subr.mxu0 %v835_v0  ;;  %600 = vmatprep.subr.mxu1 %v835_v0  ;;  %v268_v21 = vld [vmem:[#allocation5 + $0xa0] sm:$0xff]  ;;  %v267_v22 = vld [vmem:[#allocation5 + $0x98] sm:$0xff]  ;;  %v266_v24 = vld [vmem:[#allocation5 + $0x90] sm:$0xff] }
  0x5c   : > { %320 = vmatpush1.msra.mxu0 %v260_v4  ;;  %625 = vmatpush1.msra.mxu1 %v260_v4  ;;  %v197_v23 = vld [vmem:[%s978_s29 + $0x8] sm:$0xff]  ;;  %v196_v25 = vld [vmem:[%s978_s29] sm:$0xff]  ;;  %v211_v28 = vld [vmem:[%s978_s29 + $0x78] sm:$0xff] }
  0x5d   : > { %321 = vmatprep.subr.mxu0 %v835_v0  ;;  %601 = vmatprep.subr.mxu1 %v835_v0  ;;  %v265_v26 = vld [vmem:[#allocation5 + $0x88] sm:$0xff]  ;;  %v223_v27 = vcvt.s32.f32 %v197_v23  ;;  %v210_v30 = vld [vmem:[%s978_s29 + $0x70] sm:$0xff]  ;;  %v222_v32 = vcvt.s32.f32 %v196_v25  ;;  %v237_v34 = vcvt.s32.f32 %v211_v28  ;;  %v212_v40 = vld [vmem:[%s978_s29 + $0x80] sm:$0xff] }
  0x5e   : > { %322 = vmatpush1.msra.mxu0 %v259_v5  ;;  %626 = vmatpush1.msra.mxu1 %v259_v5  ;;  %v199_v29 = vld [vmem:[%s978_s29 + $0x18] sm:$0xff]  ;;  %v264_v31 = vld [vmem:[#allocation5 + $0x80] sm:$0xff]  ;;  %v213_v33 = vld [vmem:[%s978_s29 + $0x88] sm:$0xff]  ;;  %v236_v37 = vcvt.s32.f32 %v210_v30  ;;  %v238_v45 = vcvt.s32.f32 %v212_v40 }
  0x5f   : > { %323 = vmatprep.subr.mxu0 %v835_v0  ;;  %602 = vmatprep.subr.mxu1 %v835_v0  ;;  %v225_v35 = vcvt.s32.f32 %v199_v29  ;;  %v198_v36 = vld [vmem:[%s978_s29 + $0x10] sm:$0xff]  ;;  %v201_v38 = vld [vmem:[%s978_s29 + $0x28] sm:$0xff]  ;;  %v239_v39 = vcvt.s32.f32 %v213_v33  ;;  %v215_v42 = vld [vmem:[%s978_s29 + $0x98] sm:$0xff] }
  0x60   : > { %324 = vmatpush1.msra.mxu0 %v258_v6  ;;  %627 = vmatpush1.msra.mxu1 %v258_v6  ;;  %v224_v41 = vcvt.s32.f32 %v198_v36  ;;  %v227_v43 = vcvt.s32.f32 %v201_v38  ;;  %v200_v44 = vld [vmem:[%s978_s29 + $0x20] sm:$0xff]  ;;  %v203_v46 = vld [vmem:[%s978_s29 + $0x38] sm:$0xff]  ;;  %v241_v47 = vcvt.s32.f32 %v215_v42  ;;  %v214_v48 = vld [vmem:[%s978_s29 + $0x90] sm:$0xff] }
  0x61   : > { %325 = vmatprep.subr.mxu0 %v835_v0  ;;  %603 = vmatprep.subr.mxu1 %v835_v0  ;;  %v226_v49 = vcvt.s32.f32 %v200_v44  ;;  %v217_v50 = vld [vmem:[%s978_s29 + $0xa8] sm:$0xff]  ;;  %v229_v51 = vcvt.s32.f32 %v203_v46  ;;  %v202_v52 = vld [vmem:[%s978_s29 + $0x30] sm:$0xff]  ;;  %v240_v53 = vcvt.s32.f32 %v214_v48  ;;  %v216_v56 = vld [vmem:[%s978_s29 + $0xa0] sm:$0xff] }
  0x62   : > { %326 = vmatpush1.msra.mxu0 %v257_v7  ;;  %628 = vmatpush1.msra.mxu1 %v257_v7  ;;  %v205_v54 = vld [vmem:[%s978_s29 + $0x48] sm:$0xff]  ;;  %v243_v55 = vcvt.s32.f32 %v217_v50  ;;  %v228_v57 = vcvt.s32.f32 %v202_v52  ;;  %v219_v58 = vld [vmem:[%s978_s29 + $0xb8] sm:$0xff]  ;;  %v204_v60 = vld [vmem:[%s978_s29 + $0x40] sm:$0xff]  ;;  %v242_v61 = vcvt.s32.f32 %v216_v56 }
  0x63   : > { %327 = vmatprep.subr.mxu0 %v835_v0  ;;  %604 = vmatprep.subr.mxu1 %v835_v0  ;;  %v231_v59 = vcvt.s32.f32 %v205_v54  ;;  %v207_v62 = vld [vmem:[%s978_s29 + $0x58] sm:$0xff]  ;;  %v245_v63 = vcvt.s32.f32 %v219_v58  ;;  %v230_v1 = vcvt.s32.f32 %v204_v60  ;;  %v221_v2 = vld [vmem:[%s978_s29 + $0xc8] sm:$0xff]  ;;  %v206_v4 = vld [vmem:[%s978_s29 + $0x50] sm:$0xff] }
  0x64   : > { %328 = vmatpush1.msra.mxu0 %v256_v8  ;;  %629 = vmatpush1.msra.mxu1 %v256_v8  ;;  %v233_v3 = vcvt.s32.f32 %v207_v62  ;;  %v209_v6 = vld [vmem:[%s978_s29 + $0x68] sm:$0xff]  ;;  %v247_v7 = vcvt.s32.f32 %v221_v2  ;;  %v220_v8 = vld [vmem:[%s978_s29 + $0xc0] sm:$0xff] }
  0x65   : > { %329 = vmatprep.subr.mxu0 %v835_v0  ;;  %605 = vmatprep.subr.mxu1 %v835_v0 }
  0x66   : > { %330 = vmatpush1.msra.mxu0 %v255_v9  ;;  %630 = vmatpush1.msra.mxu1 %v255_v9  ;;  %v232_v9 = vcvt.s32.f32 %v206_v4 }
  0x67   : > { %331 = vmatprep.subr.mxu0 %v835_v0  ;;  %606 = vmatprep.subr.mxu1 %v835_v0 }
  0x68   : > { %332 = vmatpush1.msra.mxu0 %v254_v10  ;;  %631 = vmatpush1.msra.mxu1 %v254_v10  ;;  %v235_v10 = vcvt.s32.f32 %v209_v6 }
  0x69   : > { %333 = vmatprep.subr.mxu0 %v835_v0  ;;  %607 = vmatprep.subr.mxu1 %v835_v0 }
  0x6a   : > { %334 = vmatpush1.msra.mxu0 %v253_v11  ;;  %632 = vmatpush1.msra.mxu1 %v253_v11  ;;  %v208_v11 = vld [vmem:[%s978_s29 + $0x60] sm:$0xff] }
  0x6b   : > { %335 = vmatprep.subr.mxu0 %v835_v0  ;;  %608 = vmatprep.subr.mxu1 %v835_v0 }
  0x6c   : > { %336 = vmatpush1.msra.mxu0 %v252_v12  ;;  %633 = vmatpush1.msra.mxu1 %v252_v12  ;;  %v246_v12 = vcvt.s32.f32 %v220_v8 }
  0x6d   : > { %337 = vmatprep.subr.mxu0 %v835_v0  ;;  %609 = vmatprep.subr.mxu1 %v835_v0 }
  0x6e   : > { %338 = vmatpush1.msra.mxu0 %v251_v13  ;;  %634 = vmatpush1.msra.mxu1 %v251_v13  ;;  %v234_v13 = vcvt.s32.f32 %v208_v11 }
  0x6f   : > { %339 = vmatprep.subr.mxu0 %v835_v0  ;;  %610 = vmatprep.subr.mxu1 %v835_v0 }
  0x70   : > { %340 = vmatpush1.msra.mxu0 %v250_v14  ;;  %635 = vmatpush1.msra.mxu1 %v250_v14 }
  0x71   : > { %341 = vmatprep.subr.mxu0 %v835_v0  ;;  %611 = vmatprep.subr.mxu1 %v835_v0 }
  0x72   : > { %342 = vmatpush1.msra.mxu0 %v249_v15  ;;  %636 = vmatpush1.msra.mxu1 %v249_v15 }
  0x73   : > { %343 = vmatprep.subr.mxu0 %v835_v0  ;;  %612 = vmatprep.subr.mxu1 %v835_v0 }
  0x74   : > { %344 = vmatpush1.msra.mxu0 %v248_v16  ;;  %637 = vmatpush1.msra.mxu1 %v248_v16 }
  0x75   : > { %359 = vmatprep.subr.mxu0 %v835_v0  ;;  %613 = vmatprep.subr.mxu1 %v835_v0 }
  0x76   : > { %360 = vmatpush2.msra.mxu0 %v272_v17  ;;  %638 = vmatpush2.msra.mxu1 %v272_v17 }
  0x77   : > { %361 = vmatprep.subr.mxu0 %v835_v0  ;;  %614 = vmatprep.subr.mxu1 %v835_v0 }
  0x78   : > { %362 = vmatpush2.msra.mxu0 %v271_v18  ;;  %639 = vmatpush2.msra.mxu1 %v271_v18 }
  0x79   : > { %363 = vmatprep.subr.mxu0 %v835_v0  ;;  %615 = vmatprep.subr.mxu1 %v835_v0 }
  0x7a   : > { %364 = vmatpush2.msra.mxu0 %v270_v19  ;;  %640 = vmatpush2.msra.mxu1 %v270_v19 }
  0x7b   : > { %365 = vmatprep.subr.mxu0 %v835_v0  ;;  %616 = vmatprep.subr.mxu1 %v835_v0 }
  0x7c   : > { %366 = vmatpush2.msra.mxu0 %v269_v20  ;;  %641 = vmatpush2.msra.mxu1 %v269_v20 }
  0x7d   : > { %367 = vmatprep.subr.mxu0 %v835_v0  ;;  %617 = vmatprep.subr.mxu1 %v835_v0 }
  0x7e   : > { %368 = vmatpush2.msra.mxu0 %v268_v21  ;;  %642 = vmatpush2.msra.mxu1 %v268_v21 }
  0x7f   : > { %369 = vmatprep.subr.mxu0 %v835_v0  ;;  %618 = vmatprep.subr.mxu1 %v835_v0 }
  0x80   : > { %370 = vmatpush2.msra.mxu0 %v267_v22  ;;  %643 = vmatpush2.msra.mxu1 %v267_v22 }
  0x81   : > { %371 = vmatprep.subr.mxu0 %v835_v0  ;;  %619 = vmatprep.subr.mxu1 %v835_v0 }
  0x82   : > { %372 = vmatpush2.msra.mxu0 %v266_v24  ;;  %644 = vmatpush2.msra.mxu1 %v266_v24 }
  0x83   : > { %373 = vmatprep.subr.mxu0 %v835_v0  ;;  %620 = vmatprep.subr.mxu1 %v835_v0 }
  0x84   : > { %374 = vmatpush2.msra.mxu0 %v265_v26  ;;  %645 = vmatpush2.msra.mxu1 %v265_v26 }
  0x85   : > { %375 = vmatprep.subr.mxu0 %v835_v0  ;;  %572 = vmatprep.mubr.msk.f32.mxu0 %vm273_vm0, %v223_v27 }
  0x86   : > { %376 = vmatpush2.msra.mxu0 %v264_v31  ;;  %621 = vmatprep.subr.mxu1 %v835_v0  ;;  %v218_v0 = vld [vmem:[%s978_s29 + $0xb0] sm:$0xff] }
  0x87   : > { %378 = vmatmul.mubr.f32.vlgmr.msra.gmra.mxu0 %v222_v32  ;;  %646 = vmatpush2.msra.mxu1 %v264_v31  ;;  %v244_v5 = vcvt.s32.f32 %v218_v0 }
  0x88   : > { %579 = vmatprep.mubr.msk.f32.mxu1 %vm273_vm0, %v237_v34  ;;  %573 = vmatprep.mubr.msk.f32.mxu0 %vm273_vm0, %v225_v35 }
  0x89   : > { %413 = vmatmul.mubr.f32.vlgmr.msra.gmra.mxu1 %v236_v37 }
  0x8a   : > { %580 = vmatprep.mubr.msk.f32.mxu1 %vm273_vm0, %v239_v39 }
  0x8b   : > { %383 = vmatmul.mubr.f32.gmra.mxu0 %v224_v41 }
  0x8c   : > { %574 = vmatprep.mubr.msk.f32.mxu0 %vm273_vm0, %v227_v43 }
  0x8d   : > { %418 = vmatmul.mubr.f32.gmra.mxu1 %v238_v45 }
  0x8e   : > { %581 = vmatprep.mubr.msk.f32.mxu1 %vm273_vm0, %v241_v47 }
  0x8f   : > { %388 = vmatmul.mubr.f32.gmra.mxu0 %v226_v49 }
  0x90   : > { %575 = vmatprep.mubr.msk.f32.mxu0 %vm273_vm0, %v229_v51 }
  0x91   : > { %423 = vmatmul.mubr.f32.gmra.mxu1 %v240_v53 }
  0x92   : > { %582 = vmatprep.mubr.msk.f32.mxu1 %vm273_vm0, %v243_v55 }
  0x93   : > { %393 = vmatmul.mubr.f32.gmra.mxu0 %v228_v57 }
  0x94   : > { %576 = vmatprep.mubr.msk.f32.mxu0 %vm273_vm0, %v231_v59 }
  0x95   : > { %428 = vmatmul.mubr.f32.gmra.mxu1 %v242_v61 }
  0x96   : > { %583 = vmatprep.mubr.msk.f32.mxu1 %vm273_vm0, %v245_v63 }
  0x97   : > { %398 = vmatmul.mubr.f32.gmra.mxu0 %v230_v1 }
  0x98   : > { %577 = vmatprep.mubr.msk.f32.mxu0 %vm273_vm0, %v233_v3 }
  0x99   : > { %433 = vmatmul.mubr.f32.gmra.mxu1 %v244_v5 }
  0x9a   : > { %584 = vmatprep.mubr.msk.f32.mxu1 %vm273_vm0, %v247_v7 }
  0x9b   : > { %403 = vmatmul.mubr.f32.gmra.mxu0 %v232_v9 }
  0x9c   : > { %578 = vmatprep.mubr.msk.f32.mxu0 %vm273_vm0, %v235_v10 }
  0x9d   : > { %438 = vmatmul.mubr.f32.gmra.mxu1 %v246_v12 }
  0x9f   : > { %408 = vmatmul.mubr.f32.gmra.mxu0 %v234_v13 }
 0x147   : > { %v379_v14 = vpop.f32.mrf.mxu0 }
 0x148   : > { %443 = vst [vmem:[%s1078_s23] sm:$0xff] %v379_v14 }
 0x149   : > { %v381_v15 = vpop.f32.mrf.mxu0  ;;  %v414_v16 = vpop.f32.mrf.mxu1 }
 0x14a   : > { %450 = vst [vmem:[%s1078_s23 + $0x38] sm:$0xff] %v414_v16 }
 0x14b   : > { %v384_v17 = vpop.f32.mrf.mxu0  ;;  %v416_v18 = vpop.f32.mrf.mxu1 }
 0x14c   : > { %444 = vst [vmem:[%s1078_s23 + $0x8] sm:$0xff] %v384_v17 }
 0x14d   : > { %v386_v19 = vpop.f32.mrf.mxu0  ;;  %v419_v20 = vpop.f32.mrf.mxu1 }
 0x14e   : > { %451 = vst [vmem:[%s1078_s23 + $0x40] sm:$0xff] %v419_v20 }
 0x14f   : > { %v389_v21 = vpop.f32.mrf.mxu0  ;;  %v421_v22 = vpop.f32.mrf.mxu1 }
 0x150   : > { %445 = vst [vmem:[%s1078_s23 + $0x10] sm:$0xff] %v389_v21 }
 0x151   : > { %v391_v23 = vpop.f32.mrf.mxu0  ;;  %v424_v24 = vpop.f32.mrf.mxu1 }
 0x152   : > { %452 = vst [vmem:[%s1078_s23 + $0x48] sm:$0xff] %v424_v24 }
 0x153   : > { %v394_v25 = vpop.f32.mrf.mxu0  ;;  %v426_v26 = vpop.f32.mrf.mxu1 }
 0x154   : > { %446 = vst [vmem:[%s1078_s23 + $0x18] sm:$0xff] %v394_v25 }
 0x155   : > { %v396_v27 = vpop.f32.mrf.mxu0  ;;  %v429_v28 = vpop.f32.mrf.mxu1 }
 0x156   : > { %453 = vst [vmem:[%s1078_s23 + $0x50] sm:$0xff] %v429_v28 }
 0x157   : > { %v399_v29 = vpop.f32.mrf.mxu0  ;;  %v431_v30 = vpop.f32.mrf.mxu1 }
 0x158   : > { %447 = vst [vmem:[%s1078_s23 + $0x20] sm:$0xff] %v399_v29 }
 0x159   : > { %v401_v31 = vpop.f32.mrf.mxu0  ;;  %v434_v32 = vpop.f32.mrf.mxu1 }
 0x15a   : > { %454 = vst [vmem:[%s1078_s23 + $0x58] sm:$0xff] %v434_v32 }
 0x15b   : > { %v404_v33 = vpop.f32.mrf.mxu0  ;;  %v436_v34 = vpop.f32.mrf.mxu1 }
 0x15c   : > { %448 = vst [vmem:[%s1078_s23 + $0x28] sm:$0xff] %v404_v33 }
 0x15d   : > { %v406_v35 = vpop.f32.mrf.mxu0  ;;  %v439_v36 = vpop.f32.mrf.mxu1  ;;  %463 = sbr.rel (!%p1166_p4) target bundleno = 381 (0x17d), region = 40 }
 0x15e   : > { %455 = vst [vmem:[%s1078_s23 + $0x60] sm:$0xff] %v439_v36 }
 0x15f   : > { %v409_v37 = vpop.f32.mrf.mxu0  ;;  %v441_v38 = vpop.f32.mrf.mxu1 }
 0x160   : > { %449 = vst [vmem:[%s1078_s23 + $0x30] sm:$0xff] %v409_v37 }
 0x161   : > { %v411_v39 = vpop.f32.mrf.mxu0 }
 0x162   : > { %s1176_s19 = smov (!%p466_p13, %s465_s19), 13 }
 0x163   : > { %s1097_s26 = sshll.u32 %s1176_s19, 7 }
 0x164   : > { %s470_s30 = ssub.s32 1664, %s1097_s26 }
 0x165   : > { %471 = vsyncadd %s457_s7, %s470_s30  ;;  %p586_p5 = scmp.ne.s32.totalorder %s1097_s26, 0  ;;  %s595_s21 = smul.u32 1664, %s875_s13 }
 0x166   : > { %s476_s3 = sshll.u32 %s1078_s23, 4  ;;  %s836_s16 = smov [#allocation7]   ;;  %s1110_s3 = int_to_ptr.vmem [resolvable:$true] %s476_s3 }
 0x167   : > { %s1108_s6 = scalar_lea.hbm %s1157_s2, %s595_s21  ;;  %s759_s8 = scalar_lea.vmem %s1110_s3, %s1097_s26 }
 0x168   : > { %p760_p1 = scmp.ne.s32.totalorder %s1110_s3, %s759_s8  ;;  %s763_s17 = sshll.u32 %s836_s16, 4  ;;  %s764_s17 = int_to_ptr.vmem [resolvable:$false] %s763_s17 }
 0x169   : > { %s765_s13 = scalar_lea.vmem %s764_s17, 3328  ;;  %p766_p3 = scmp.lt.s32.totalorder %s1110_s3, %s764_s17 }
 0x16a   : > { %p761_p0 = pnand %p760_p1, %p586_p5  ;;  %p767_p8 = scmp.lt.s32.totalorder %s765_s13, %s759_s8 }
 0x16c   : > { %p762_p7 = pneg %p761_p0  ;;  %p768_p9 = por %p767_p8, %p766_p3 }
 0x16e   : > { %p769_p6 = pnand %p768_p9, %p762_p7 }
 0x170   : > { %772 = shalt.err (!%p769_p6)
}
 0x171   : > { %s773_s24 = scalar_lea.hbm %s1108_s6, %s1097_s26  ;;  %s777_s29 = scalar_lea.hbm %s1157_s2, 3200 }
 0x172   : > { %p774_p11 = scmp.ne.s32.totalorder %s1108_s6, %s773_s24  ;;  %p778_p10 = scmp.lt.s32.totalorder %s1108_s6, %s1157_s2 }
 0x173   : > { %p779_p4 = scmp.lt.s32.totalorder %s777_s29, %s773_s24 }
 0x174   : > { %p775_p12 = pnand %p774_p11, %p586_p5 }
 0x175   : > { %p780_p13 = por %p779_p4, %p778_p10 }
 0x176   : > { %p776_p2 = pneg %p775_p12 }
 0x178   : > { %p781_p1 = pnand %p780_p13, %p776_p2 }
 0x17a   : > { %784 = shalt.err (!%p781_p1)
}
 0x17b   : > { %s837_s14 = smov 128   ;;  %s838_s19 = smov 8  }
 0x17c   : > { %482 = dma.vmem_to_hbm [thread:$0]  (%p586_p5), %s1110_s3, %s1097_s26, %s1108_s6, %s457_s7, %s837_s14, %s837_s14, %s838_s19  }
 0x17d PF: > { %s491_s30 = sand.u32 1, %s815_s9   ;;  %p1167_p0 = scmp.ne.s32.totalorder %s1163_s22, 0 }
 0x17e   : > { %p1168_p7 = scmp.ge.s32.totalorder %s827_s12, 2  ;;  %s492_s21 = scalar_lea.sflag [#allocation4], %s491_s30 }
 0x180   : > { %p661_p3 = pnand %p1168_p7, %p1167_p0 }
 0x182   : > { %p662_p8 = pneg %p661_p3 }
 0x184   : > { %810 = dma.done.wait (%p662_p8), %s492_s21, 1664  }
 0x185   : > { %812 = vsyncadd (%p662_p8), %s492_s21, 4294965632  ;;  %p16_p9 = scmp.ge.s32.totalorder %s879_s15, 4   ;;  %s1169_s9 = smov %s819_s10 }
 0x186   : > { %s1170_s10 = smov %s823_s11  ;;  %s1171_s11 = smov %s891_s18 }
 0x187   : > { %s1172_s12 = smov %s879_s15  ;;  %18 = sbr.rel (!%p16_p9) target bundleno = 6 (0x6), region = 77 }
 0x18c   :  { %497 = vsyncpa [#allocation3], 1 }
 0x18d   :  { %499 = vsyncpa [#allocation3 + $0x1], 1 }
 0x18e   :  { %500 = vsyncpa [#allocation6], 1 }
 0x18f   :  { %501 = vsyncpa [#allocation4], 1 }
 0x190   :  { %503 = vsyncpa [#allocation4 + $0x1], 1 }

</bundles_post_ra>
